<compile_context>
chip_gen: v7x
topology: tpu7x:2x2x1
jax: 0.10.0
libtpu: 0.0.40
codegen_flags: <defaults>
</compile_context>

<pallas_src>
import math

import numpy as np
import jax
import jax.numpy as jnp
from jax.experimental import pallas as pl
from jax.experimental.pallas import tpu as pltpu

_PI = math.pi
_TAN_PI_8 = 0.4142135623730950488  # tan(pi/8)
_TINY = 1e-30


def _atan_reduced(t):
    # Cephes atanf minimax polynomial, valid for |t| <= tan(pi/8).
    z = t * t
    p = 8.05374449538e-2
    p = p * z - 1.38776856032e-1
    p = p * z + 1.99777106478e-1
    p = p * z - 3.33329491539e-1
    return p * z * t + t


def _atan2(y, x):
    # Quadrant-correct atan2 built only from add/mul/div/compare/select (VPU ops).
    ax = jnp.abs(x)
    ay = jnp.abs(y)
    mx = jnp.maximum(ax, ay)
    mn = jnp.minimum(ax, ay)
    a = mn / jnp.maximum(mx, _TINY)               # a in [0, 1]
    mid = a > _TAN_PI_8                           # reduce (tan(pi/8), 1] -> |t| <= tan(pi/8)
    t = jnp.where(mid, (a - 1.0) / (a + 1.0), a)
    r = jnp.where(mid, _PI / 4.0, 0.0) + _atan_reduced(t)
    r = jnp.where(ay > ax, _PI / 2.0 - r, r)      # undo the min/max swap
    r = jnp.where(x < 0.0, _PI - r, r)            # left half-plane
    r = jnp.where(y < 0.0, -r, r)                 # lower half-plane
    return r


def _phase_loss_kernel(x_ref, mr_ref, mi_ref, out_ref):
    # x_ref  : (2, T, HW)   [0] = predicted images (rows), [1] = target images
    # mr/mi  : (HW, HW)     real / imag parts of kron(F_H, F_W)
    # out_ref: (1, 8, 128)  per-step partial-sum tile (scalar splatted lane-dense)
    t = x_ref.shape[1]
    hw = x_ref.shape[2]
    x = x_ref[...].reshape(2 * t, hw)             # leading-dim merge only (cheap)

    # fft2 of every image (pred + target fused) as two MXU matmuls.
    yr = jnp.dot(x, mr_ref[...], preferred_element_type=jnp.float32)
    yi = jnp.dot(x, mi_ref[...], preferred_element_type=jnp.float32)

    # angle(); the 2*pi wrap of the reference is a no-op and omitted.
    ph = _atan2(yi, yr)                           # (2T, HW), lane-dense last dim

    diff = ph[:t, :] - ph[t:, :]                  # predicted phase - target phase
    partial = jnp.sum(jnp.abs(diff))
    out_ref[...] = jnp.broadcast_to(partial, out_ref.shape)


def _dft2_kron(h, w):
    # M[(i,j),(u,v)] = exp(-2*pi*1j*(i*u/h + j*v/w)); returns (cos, sin) parts,
    # each (h*w, h*w) float32.  Angles reduced mod 2*pi via integer arithmetic.
    ih = jnp.arange(h, dtype=jnp.int32)
    iw = jnp.arange(w, dtype=jnp.int32)
    ah = (-2.0 * _PI / h) * ((ih[:, None] * ih[None, :]) % h).astype(jnp.float32)
    aw = (-2.0 * _PI / w) * ((iw[:, None] * iw[None, :]) % w).astype(jnp.float32)
    ang = (ah[:, None, :, None] + aw[None, :, None, :]).reshape(h * w, h * w)
    return jnp.cos(ang), jnp.sin(ang)


def _pairs_per_step(n_pairs, hw):
    # Largest divisor of n_pairs whose (2, T, HW) float32 block stays under ~8 MiB,
    # preferring sublane-friendly sizes (full extent, else a multiple of 8).
    budget = max(1, (8 * 1024 * 1024) // (2 * hw * 4))
    if n_pairs <= budget:
        return n_pairs
    divisors = [d for d in range(1, n_pairs + 1) if n_pairs % d == 0 and d <= budget]
    mult8 = [d for d in divisors if d % 8 == 0]
    return max(mult8) if mult8 else max(divisors)


def phase_loss(predicted, target):
    """mean(|angle(fft2(predicted)) - angle(fft2(target))|) over all elements."""
    b, c, h, w = predicted.shape
    n = b * c
    hw = h * w
    # TODO(synk): for large spatial dims switch to a separable two-pass DFT; the
    # kron(F_H, F_W) operator is O((H*W)^2) memory and is sized for small images.
    p_img = predicted.reshape(n, hw).astype(jnp.float32)
    t_img = target.reshape(n, hw).astype(jnp.float32)
    x = jnp.stack([p_img, t_img], axis=0)         # (2, N, HW): pred, then target

    mr, mi = _dft2_kron(h, w)

    pairs = _pairs_per_step(n, hw)                # images (pairs) per grid step
    num_steps = n // pairs

    partial = pl.pallas_call(
        _phase_loss_kernel,
        out_shape=jax.ShapeDtypeStruct((num_steps, 8, 128), jnp.float32),
        grid=(num_steps,),
        in_specs=[
            pl.BlockSpec((2, pairs, hw), lambda i: (0, i, 0)),
            pl.BlockSpec((hw, hw), lambda i: (0, 0)),
            pl.BlockSpec((hw, hw), lambda i: (0, 0)),
        ],
        out_specs=pl.BlockSpec((1, 8, 128), lambda i: (i, 0, 0)),
        compiler_params=pltpu.CompilerParams(dimension_semantics=("parallel",)),
    )(x, mr, mi)

    return jnp.sum(partial[:, 0, 0]) / float(n * hw)


def _reference_numpy(pr, tg):
    # Same semantics as the PyTorch module, evaluated with NumPy (float64 FFT).
    pf = np.fft.fft2(np.asarray(pr), axes=(-2, -1))
    tf = np.fft.fft2(np.asarray(tg), axes=(-2, -1))
    pp = np.angle(pf)
    tp = np.angle(tf)
    pp = pp - 2 * np.pi * np.round(pp / (2 * np.pi))
    tp = tp - 2 * np.pi * np.round(tp / (2 * np.pi))
    return np.mean(np.abs(pp - tp))


if __name__ == "__main__":
    key = jax.random.PRNGKey(0)
    k1, k2 = jax.random.split(key)
    B, C, H, W = 2, 4, 16, 16
    predicted = jax.random.normal(k1, (B, C, H, W), dtype=jnp.float32)
    target = jax.random.normal(k2, (B, C, H, W), dtype=jnp.float32)

    loss = jax.jit(phase_loss)(predicted, target)
    loss = jax.block_until_ready(loss)

    ref = _reference_numpy(predicted, target)
    # Tolerance: f32 DFT-by-matmul + polynomial atan2 vs. float64 NumPy FFT; the
    # few exactly-real FFT bins (angle() branch cuts) can each differ by 2*pi.
    assert np.isfinite(float(loss)), float(loss)
    assert abs(float(loss) - float(ref)) < 5e-2, (float(loss), float(ref))
    print("KERNEL_OK")
</pallas_src>

<mosaic_0001>
module attributes {stable_mosaic.version = 11 : i64} {
  func.func @_phase_loss_kernel(%arg0: i32, %arg1: memref<2x8x256xf32, #tpu.memory_space<vmem>>, %arg2: memref<256x256xf32, #tpu.memory_space<vmem>>, %arg3: memref<256x256xf32, #tpu.memory_space<vmem>>, %arg4: memref<1x8x128xf32, #tpu.memory_space<vmem>>) attributes {dimension_semantics = [#tpu.dimension_semantics<parallel>], iteration_bounds = array<i64: 1>, scalar_prefetch = 0 : i64, scratch_operands = 0 : i64, tpu.core_type = #tpu.core_type<tc>, window_params = [{transform_indices = @transform_0, window_bounds = array<i64: 2, 8, 256>}, {pipeline_mode = #tpu.pipeline_mode<synchronous>, transform_indices = @transform_1, window_bounds = array<i64: 256, 256>}, {pipeline_mode = #tpu.pipeline_mode<synchronous>, transform_indices = @transform_2, window_bounds = array<i64: 256, 256>}, {transform_indices = @transform_3, window_bounds = array<i64: 1, 8, 128>}]} {
    %c0 = arith.constant 0 : index
    %c0_0 = arith.constant 0 : index
    %c0_1 = arith.constant 0 : index
    %0 = vector.load %arg1[%c0, %c0_0, %c0_1] : memref<2x8x256xf32, #tpu.memory_space<vmem>>, vector<2x8x256xf32>
    %1 = vector.shape_cast %0 : vector<2x8x256xf32> to vector<16x256xf32>
    %c0_2 = arith.constant 0 : index
    %c0_3 = arith.constant 0 : index
    %2 = vector.load %arg2[%c0_2, %c0_3] : memref<256x256xf32, #tpu.memory_space<vmem>>, vector<256x256xf32>
    %cst = arith.constant dense<0.000000e+00> : vector<16x256xf32>
    %3 = tpu.matmul %1, %2, %cst {dimension_numbers = #tpu.dot_dimension_numbers<[1], [0], [0], [1], [0, 0, 1, 1], [], []>} : vector<16x256xf32>, vector<256x256xf32>, vector<16x256xf32> -> vector<16x256xf32>
    %c0_4 = arith.constant 0 : index
    %c0_5 = arith.constant 0 : index
    %4 = vector.load %arg3[%c0_4, %c0_5] : memref<256x256xf32, #tpu.memory_space<vmem>>, vector<256x256xf32>
    %cst_6 = arith.constant dense<0.000000e+00> : vector<16x256xf32>
    %5 = tpu.matmul %1, %4, %cst_6 {dimension_numbers = #tpu.dot_dimension_numbers<[1], [0], [0], [1], [0, 0, 1, 1], [], []>} : vector<16x256xf32>, vector<256x256xf32>, vector<16x256xf32> -> vector<16x256xf32>
    %6 = math.absf %3 : vector<16x256xf32>
    %7 = math.absf %5 : vector<16x256xf32>
    %8 = arith.maximumf %6, %7 : vector<16x256xf32>
    %9 = arith.minimumf %6, %7 : vector<16x256xf32>
    %cst_7 = arith.constant 1.000000e-30 : f32
    %10 = vector.broadcast %cst_7 : f32 to vector<16x256xf32>
    %11 = arith.maximumf %8, %10 : vector<16x256xf32>
    %12 = arith.divf %9, %11 : vector<16x256xf32>
    %cst_8 = arith.constant 0.414213568 : f32
    %13 = vector.broadcast %cst_8 : f32 to vector<16x256xf32>
    %14 = arith.cmpf ogt, %12, %13 : vector<16x256xf32>
    %cst_9 = arith.constant 1.000000e+00 : f32
    %15 = vector.broadcast %cst_9 : f32 to vector<16x256xf32>
    %16 = arith.subf %12, %15 : vector<16x256xf32>
    %cst_10 = arith.constant 1.000000e+00 : f32
    %17 = vector.broadcast %cst_10 : f32 to vector<16x256xf32>
    %18 = arith.addf %12, %17 : vector<16x256xf32>
    %19 = arith.divf %16, %18 : vector<16x256xf32>
    %20 = arith.select %14, %19, %12 : vector<16x256xi1>, vector<16x256xf32>
    %cst_11 = arith.constant 0.785398185 : f32
    %cst_12 = arith.constant 0.000000e+00 : f32
    %21 = vector.broadcast %cst_11 : f32 to vector<16x256xf32>
    %22 = vector.broadcast %cst_12 : f32 to vector<16x256xf32>
    %23 = arith.select %14, %21, %22 : vector<16x256xi1>, vector<16x256xf32>
    %24 = arith.mulf %20, %20 : vector<16x256xf32>
    %cst_13 = arith.constant 0.0805374458 : f32
    %25 = vector.broadcast %cst_13 : f32 to vector<16x256xf32>
    %26 = arith.mulf %25, %24 : vector<16x256xf32>
    %cst_14 = arith.constant 0.138776854 : f32
    %27 = vector.broadcast %cst_14 : f32 to vector<16x256xf32>
    %28 = arith.subf %26, %27 : vector<16x256xf32>
    %29 = arith.mulf %28, %24 : vector<16x256xf32>
    %cst_15 = arith.constant 0.199777111 : f32
    %30 = vector.broadcast %cst_15 : f32 to vector<16x256xf32>
    %31 = arith.addf %29, %30 : vector<16x256xf32>
    %32 = arith.mulf %31, %24 : vector<16x256xf32>
    %cst_16 = arith.constant 0.333329499 : f32
    %33 = vector.broadcast %cst_16 : f32 to vector<16x256xf32>
    %34 = arith.subf %32, %33 : vector<16x256xf32>
    %35 = arith.mulf %34, %24 : vector<16x256xf32>
    %36 = arith.mulf %35, %20 : vector<16x256xf32>
    %37 = arith.addf %36, %20 : vector<16x256xf32>
    %38 = arith.addf %23, %37 : vector<16x256xf32>
    %39 = arith.cmpf ogt, %7, %6 : vector<16x256xf32>
    %cst_17 = arith.constant 1.57079637 : f32
    %40 = vector.broadcast %cst_17 : f32 to vector<16x256xf32>
    %41 = arith.subf %40, %38 : vector<16x256xf32>
    %42 = arith.select %39, %41, %38 : vector<16x256xi1>, vector<16x256xf32>
    %cst_18 = arith.constant 0.000000e+00 : f32
    %43 = vector.broadcast %cst_18 : f32 to vector<16x256xf32>
    %44 = arith.cmpf olt, %3, %43 : vector<16x256xf32>
    %cst_19 = arith.constant 3.14159274 : f32
    %45 = vector.broadcast %cst_19 : f32 to vector<16x256xf32>
    %46 = arith.subf %45, %42 : vector<16x256xf32>
    %47 = arith.select %44, %46, %42 : vector<16x256xi1>, vector<16x256xf32>
    %cst_20 = arith.constant 0.000000e+00 : f32
    %48 = vector.broadcast %cst_20 : f32 to vector<16x256xf32>
    %49 = arith.cmpf olt, %5, %48 : vector<16x256xf32>
    %cst_21 = arith.constant 0.000000e+00 : f32
    %50 = vector.broadcast %cst_21 : f32 to vector<16x256xf32>
    %51 = arith.subf %50, %47 : vector<16x256xf32>
    %52 = arith.select %49, %51, %47 : vector<16x256xi1>, vector<16x256xf32>
    %53 = vector.extract_strided_slice %52 {offsets = [0, 0], sizes = [8, 256], strides = [1, 1]} : vector<16x256xf32> to vector<8x256xf32>
    %54 = vector.extract_strided_slice %52 {offsets = [8, 0], sizes = [8, 256], strides = [1, 1]} : vector<16x256xf32> to vector<8x256xf32>
    %55 = arith.subf %53, %54 : vector<8x256xf32>
    %56 = math.absf %55 : vector<8x256xf32>
    %57 = vector.shape_cast %56 : vector<8x256xf32> to vector<1x8x256xf32>
    %cst_22 = arith.constant dense<0.000000e+00> : vector<1xf32>
    %58 = vector.multi_reduction <add>, %57, %cst_22 [1, 2] : vector<1x8x256xf32> to vector<1xf32>
    %59 = vector.shape_cast %58 : vector<1xf32> to vector<1x1x1xf32>
    %60 = vector.extract %59[0, 0, 0] : f32 from vector<1x1x1xf32>
    %61 = vector.broadcast %60 : f32 to vector<1x8x128xf32>
    %c0_23 = arith.constant 0 : index
    %c0_24 = arith.constant 0 : index
    %c0_25 = arith.constant 0 : index
    %62 = vector.load %arg4[%c0_23, %c0_24, %c0_25] : memref<1x8x128xf32, #tpu.memory_space<vmem>>, vector<1x8x128xf32>
    tpu.vector_store %arg4[%c0_23, %c0_24, %c0_25], %61 {strides = array<i32>} : memref<1x8x128xf32, #tpu.memory_space<vmem>>, vector<1x8x128xf32>,
    return
  }
  func.func @transform_0(%arg0: i32) -> (i32, i32, i32) {
    %c0_i32 = arith.constant 0 : i32
    %c0_i32_0 = arith.constant 0 : i32
    %c0_i32_1 = arith.constant 0 : i32
    return %c0_i32, %arg0, %c0_i32_0 : i32, i32, i32
  }
  func.func @transform_1(%arg0: i32) -> (i32, i32) {
    %c0_i32 = arith.constant 0 : i32
    %c0_i32_0 = arith.constant 0 : i32
    %c0_i32_1 = arith.constant 0 : i32
    return %c0_i32, %c0_i32_0 : i32, i32
  }
  func.func @transform_2(%arg0: i32) -> (i32, i32) {
    %c0_i32 = arith.constant 0 : i32
    %c0_i32_0 = arith.constant 0 : i32
    %c0_i32_1 = arith.constant 0 : i32
    return %c0_i32, %c0_i32_0 : i32, i32
  }
  func.func @transform_3(%arg0: i32) -> (i32, i32, i32) {
    %c0_i32 = arith.constant 0 : i32
    %c0_i32_0 = arith.constant 0 : i32
    %c0_i32_1 = arith.constant 0 : i32
    return %arg0, %c0_i32, %c0_i32_0 : i32, i32, i32
  }
}

</mosaic_0001>

<bundles_post_ra>
// kernel: phase_loss.1
= control target key start
LH: loop header
LB: loop body
LE: loop exit
PB: predicated region body
PF: predicated region fallthrough
CT: control target
= control target key end

     0   :  { %s1159_s1 = inlined_call_operand.vmem [shape: f32[256,256], index: 1, kind: input, shape index: {}]   ;;  %s1160_s2 = inlined_call_operand.vmem [shape: f32[256,256], index: 2, kind: input, shape index: {}]   ;;  %s1161_s0 = inlined_call_operand.vmem [shape: f32[2,8,256], index: 0, kind: input, shape index: {}]   ;;  %s1162_s3 = inlined_call_operand.vmem [shape: f32[1,8,128], index: 3, kind: output, shape index: {}]  }
   0x1   :  { %v19_v0 = vld [vmem:[%s1159_s1 + $0x8] sm:$0xff]  ;;  %v21_v1 = vld [vmem:[%s1159_s1 + $0x18] sm:$0xff]  ;;  %v18_v5 = vld [vmem:[%s1159_s1] sm:$0xff] }
   0x2   :  { %v160_v2 = vld [vmem:[%s1160_s2 + $0x8] sm:$0xff]  ;;  %v468_v3 = vpack.c.bf16 %v21_v1, %v19_v0  ;;  %v162_v4 = vld [vmem:[%s1160_s2 + $0x18] sm:$0xff]  ;;  %v20_v6 = vld [vmem:[%s1159_s1 + $0x10] sm:$0xff] }
   0x3   :  { %v532_v7 = vpack.c.bf16 %v162_v4, %v160_v2  ;;  %v470_v8 = vpack.c.bf16 %v20_v6, %v18_v5  ;;  %v159_v9 = vld [vmem:[%s1160_s2] sm:$0xff]  ;;  %v161_v10 = vld [vmem:[%s1160_s2 + $0x10] sm:$0xff]  ;;  %v23_v11 = vld [vmem:[%s1159_s1 + $0x28] sm:$0xff] }
   0x4   :  { %469 = vmatprep.subr.bf16.mxu0 %v468_v3  ;;  %v534_v12 = vpack.c.bf16 %v161_v10, %v159_v9  ;;  %v25_v13 = vld [vmem:[%s1159_s1 + $0x38] sm:$0xff]  ;;  %v164_v14 = vld [vmem:[%s1160_s2 + $0x28] sm:$0xff]  ;;  %v22_v18 = vld [vmem:[%s1159_s1 + $0x20] sm:$0xff] }
   0x5   :  { %v166_v15 = vld [vmem:[%s1160_s2 + $0x38] sm:$0xff]  ;;  %533 = vmatprep.subr.bf16.mxu1 %v532_v7  ;;  %471 = vmatpush1.bf16.msra.mxu0 %v470_v8  ;;  %v472_v16 = vpack.c.bf16 %v25_v13, %v23_v11  ;;  %v24_v19 = vld [vmem:[%s1159_s1 + $0x30] sm:$0xff]  ;;  %v163_v20 = vld [vmem:[%s1160_s2 + $0x20] sm:$0xff] }
   0x6   :  { %v536_v17 = vpack.c.bf16 %v166_v15, %v164_v14  ;;  %535 = vmatpush1.bf16.msra.mxu1 %v534_v12  ;;  %v474_v21 = vpack.c.bf16 %v24_v19, %v22_v18  ;;  %v165_v22 = vld [vmem:[%s1160_s2 + $0x30] sm:$0xff]  ;;  %v27_v23 = vld [vmem:[%s1159_s1 + $0x48] sm:$0xff]  ;;  %v29_v24 = vld [vmem:[%s1159_s1 + $0x58] sm:$0xff] }
   0x7   :  { %473 = vmatprep.subr.bf16.mxu0 %v472_v16  ;;  %v538_v25 = vpack.c.bf16 %v165_v22, %v163_v20  ;;  %v476_v26 = vpack.c.bf16 %v29_v24, %v27_v23  ;;  %v168_v27 = vld [vmem:[%s1160_s2 + $0x48] sm:$0xff]  ;;  %v170_v28 = vld [vmem:[%s1160_s2 + $0x58] sm:$0xff]  ;;  %v26_v29 = vld [vmem:[%s1159_s1 + $0x40] sm:$0xff] }
   0x8   :  { %537 = vmatprep.subr.bf16.mxu1 %v536_v17  ;;  %v540_v30 = vpack.c.bf16 %v170_v28, %v168_v27  ;;  %v28_v31 = vld [vmem:[%s1159_s1 + $0x50] sm:$0xff]  ;;  %v167_v32 = vld [vmem:[%s1160_s2 + $0x40] sm:$0xff]  ;;  %v31_v35 = vld [vmem:[%s1159_s1 + $0x68] sm:$0xff] }
   0x9   :  { %v169_v33 = vld [vmem:[%s1160_s2 + $0x50] sm:$0xff]  ;;  %475 = vmatpush1.bf16.msra.mxu0 %v474_v21  ;;  %v478_v34 = vpack.c.bf16 %v28_v31, %v26_v29  ;;  %v33_v36 = vld [vmem:[%s1159_s1 + $0x78] sm:$0xff]  ;;  %v172_v37 = vld [vmem:[%s1160_s2 + $0x68] sm:$0xff] }
   0xa   :  { %539 = vmatpush1.bf16.msra.mxu1 %v538_v25  ;;  %477 = vmatprep.subr.bf16.mxu0 %v476_v26  ;;  %v542_v38 = vpack.c.bf16 %v169_v33, %v167_v32  ;;  %v480_v39 = vpack.c.bf16 %v33_v36, %v31_v35  ;;  %v174_v40 = vld [vmem:[%s1160_s2 + $0x78] sm:$0xff]  ;;  %v30_v41 = vld [vmem:[%s1159_s1 + $0x60] sm:$0xff]  ;;  %v32_v42 = vld [vmem:[%s1159_s1 + $0x70] sm:$0xff] }
   0xb   :  { %541 = vmatprep.subr.bf16.mxu1 %v540_v30  ;;  %v544_v43 = vpack.c.bf16 %v174_v40, %v172_v37  ;;  %v171_v44 = vld [vmem:[%s1160_s2 + $0x60] sm:$0xff]  ;;  %v173_v45 = vld [vmem:[%s1160_s2 + $0x70] sm:$0xff]  ;;  %v35_v46 = vld [vmem:[%s1159_s1 + $0x88] sm:$0xff]  ;;  %v482_v50 = vpack.c.bf16 %v32_v42, %v30_v41 }
   0xc   :  { %v37_v47 = vld [vmem:[%s1159_s1 + $0x98] sm:$0xff]  ;;  %v176_v48 = vld [vmem:[%s1160_s2 + $0x88] sm:$0xff]  ;;  %v546_v51 = vpack.c.bf16 %v173_v45, %v171_v44  ;;  %v34_v53 = vld [vmem:[%s1159_s1 + $0x80] sm:$0xff] }
   0xd   :  { %v178_v49 = vld [vmem:[%s1160_s2 + $0x98] sm:$0xff]  ;;  %479 = vmatpush1.bf16.msra.mxu0 %v478_v34  ;;  %v484_v52 = vpack.c.bf16 %v37_v47, %v35_v46  ;;  %v36_v54 = vld [vmem:[%s1159_s1 + $0x90] sm:$0xff]  ;;  %v175_v55 = vld [vmem:[%s1160_s2 + $0x80] sm:$0xff] }
   0xe   :  { %543 = vmatpush1.bf16.msra.mxu1 %v542_v38  ;;  %481 = vmatprep.subr.bf16.mxu0 %v480_v39  ;;  %v548_v56 = vpack.c.bf16 %v178_v49, %v176_v48  ;;  %v177_v57 = vld [vmem:[%s1160_s2 + $0x90] sm:$0xff]  ;;  %v39_v58 = vld [vmem:[%s1159_s1 + $0xa8] sm:$0xff]  ;;  %v41_v59 = vld [vmem:[%s1159_s1 + $0xb8] sm:$0xff]  ;;  %v486_v62 = vpack.c.bf16 %v36_v54, %v34_v53 }
   0xf   :  { %545 = vmatprep.subr.bf16.mxu1 %v544_v43  ;;  %v180_v60 = vld [vmem:[%s1160_s2 + $0xa8] sm:$0xff]  ;;  %v182_v61 = vld [vmem:[%s1160_s2 + $0xb8] sm:$0xff]  ;;  %v550_v63 = vpack.c.bf16 %v177_v57, %v175_v55  ;;  %v488_v0 = vpack.c.bf16 %v41_v59, %v39_v58  ;;  %v38_v1 = vld [vmem:[%s1159_s1 + $0xa0] sm:$0xff] }
  0x10   :  { %v40_v2 = vld [vmem:[%s1159_s1 + $0xb0] sm:$0xff]  ;;  %v179_v3 = vld [vmem:[%s1160_s2 + $0xa0] sm:$0xff]  ;;  %v552_v4 = vpack.c.bf16 %v182_v61, %v180_v60  ;;  %v43_v6 = vld [vmem:[%s1159_s1 + $0xc8] sm:$0xff] }
  0x11   :  { %483 = vmatpush1.bf16.msra.mxu0 %v482_v50  ;;  %v181_v5 = vld [vmem:[%s1160_s2 + $0xb0] sm:$0xff]  ;;  %v45_v7 = vld [vmem:[%s1159_s1 + $0xd8] sm:$0xff]  ;;  %v184_v8 = vld [vmem:[%s1160_s2 + $0xc8] sm:$0xff]  ;;  %v490_v10 = vpack.c.bf16 %v40_v2, %v38_v1 }
  0x12   :  { %547 = vmatpush1.bf16.msra.mxu1 %v546_v51  ;;  %485 = vmatprep.subr.bf16.mxu0 %v484_v52  ;;  %v186_v9 = vld [vmem:[%s1160_s2 + $0xd8] sm:$0xff]  ;;  %v554_v11 = vpack.c.bf16 %v181_v5, %v179_v3  ;;  %v492_v12 = vpack.c.bf16 %v45_v7, %v43_v6  ;;  %v42_v13 = vld [vmem:[%s1159_s1 + $0xc0] sm:$0xff]  ;;  %v44_v14 = vld [vmem:[%s1159_s1 + $0xd0] sm:$0xff] }
  0x13   :  { %549 = vmatprep.subr.bf16.mxu1 %v548_v56  ;;  %v183_v15 = vld [vmem:[%s1160_s2 + $0xc0] sm:$0xff]  ;;  %v556_v16 = vpack.c.bf16 %v186_v9, %v184_v8  ;;  %v185_v17 = vld [vmem:[%s1160_s2 + $0xd0] sm:$0xff]  ;;  %v47_v18 = vld [vmem:[%s1159_s1 + $0xe8] sm:$0xff]  ;;  %v494_v22 = vpack.c.bf16 %v44_v14, %v42_v13 }
  0x14   :  { %v49_v19 = vld [vmem:[%s1159_s1 + $0xf8] sm:$0xff]  ;;  %v188_v20 = vld [vmem:[%s1160_s2 + $0xe8] sm:$0xff]  ;;  %v558_v23 = vpack.c.bf16 %v185_v17, %v183_v15  ;;  %v46_v25 = vld [vmem:[%s1159_s1 + $0xe0] sm:$0xff] }
  0x15   :  { %487 = vmatpush1.bf16.msra.mxu0 %v486_v62  ;;  %v190_v21 = vld [vmem:[%s1160_s2 + $0xf8] sm:$0xff]  ;;  %v496_v24 = vpack.c.bf16 %v49_v19, %v47_v18  ;;  %v48_v26 = vld [vmem:[%s1159_s1 + $0xf0] sm:$0xff]  ;;  %v187_v27 = vld [vmem:[%s1160_s2 + $0xe0] sm:$0xff] }
  0x16   :  { %551 = vmatpush1.bf16.msra.mxu1 %v550_v63  ;;  %489 = vmatprep.subr.bf16.mxu0 %v488_v0  ;;  %v560_v28 = vpack.c.bf16 %v190_v21, %v188_v20  ;;  %v189_v29 = vld [vmem:[%s1160_s2 + $0xf0] sm:$0xff]  ;;  %v51_v30 = vld [vmem:[%s1159_s1 + $0x108] sm:$0xff]  ;;  %v53_v31 = vld [vmem:[%s1159_s1 + $0x118] sm:$0xff]  ;;  %v498_v34 = vpack.c.bf16 %v48_v26, %v46_v25 }
  0x17   :  { %553 = vmatprep.subr.bf16.mxu1 %v552_v4  ;;  %v192_v32 = vld [vmem:[%s1160_s2 + $0x108] sm:$0xff]  ;;  %v194_v33 = vld [vmem:[%s1160_s2 + $0x118] sm:$0xff]  ;;  %v562_v35 = vpack.c.bf16 %v189_v29, %v187_v27  ;;  %v500_v36 = vpack.c.bf16 %v53_v31, %v51_v30  ;;  %v50_v37 = vld [vmem:[%s1159_s1 + $0x100] sm:$0xff] }
  0x18   :  { %v52_v38 = vld [vmem:[%s1159_s1 + $0x110] sm:$0xff]  ;;  %v191_v39 = vld [vmem:[%s1160_s2 + $0x100] sm:$0xff]  ;;  %v564_v40 = vpack.c.bf16 %v194_v33, %v192_v32  ;;  %v55_v42 = vld [vmem:[%s1159_s1 + $0x128] sm:$0xff] }
  0x19   :  { %491 = vmatpush1.bf16.msra.mxu0 %v490_v10  ;;  %v193_v41 = vld [vmem:[%s1160_s2 + $0x110] sm:$0xff]  ;;  %v57_v43 = vld [vmem:[%s1159_s1 + $0x138] sm:$0xff]  ;;  %v196_v44 = vld [vmem:[%s1160_s2 + $0x128] sm:$0xff]  ;;  %v502_v46 = vpack.c.bf16 %v52_v38, %v50_v37 }
  0x1a   :  { %555 = vmatpush1.bf16.msra.mxu1 %v554_v11  ;;  %493 = vmatprep.subr.bf16.mxu0 %v492_v12  ;;  %v198_v45 = vld [vmem:[%s1160_s2 + $0x138] sm:$0xff]  ;;  %v566_v47 = vpack.c.bf16 %v193_v41, %v191_v39  ;;  %v504_v48 = vpack.c.bf16 %v57_v43, %v55_v42  ;;  %v54_v49 = vld [vmem:[%s1159_s1 + $0x120] sm:$0xff]  ;;  %v56_v50 = vld [vmem:[%s1159_s1 + $0x130] sm:$0xff] }
  0x1b   :  { %557 = vmatprep.subr.bf16.mxu1 %v556_v16  ;;  %v195_v51 = vld [vmem:[%s1160_s2 + $0x120] sm:$0xff]  ;;  %v568_v52 = vpack.c.bf16 %v198_v45, %v196_v44  ;;  %v197_v53 = vld [vmem:[%s1160_s2 + $0x130] sm:$0xff]  ;;  %v59_v54 = vld [vmem:[%s1159_s1 + $0x148] sm:$0xff]  ;;  %v506_v58 = vpack.c.bf16 %v56_v50, %v54_v49 }
  0x1c   :  { %v61_v55 = vld [vmem:[%s1159_s1 + $0x158] sm:$0xff]  ;;  %v200_v56 = vld [vmem:[%s1160_s2 + $0x148] sm:$0xff]  ;;  %v570_v59 = vpack.c.bf16 %v197_v53, %v195_v51  ;;  %v58_v61 = vld [vmem:[%s1159_s1 + $0x140] sm:$0xff] }
  0x1d   :  { %495 = vmatpush1.bf16.msra.mxu0 %v494_v22  ;;  %v202_v57 = vld [vmem:[%s1160_s2 + $0x158] sm:$0xff]  ;;  %v508_v60 = vpack.c.bf16 %v61_v55, %v59_v54  ;;  %v60_v62 = vld [vmem:[%s1159_s1 + $0x150] sm:$0xff]  ;;  %v199_v63 = vld [vmem:[%s1160_s2 + $0x140] sm:$0xff] }
  0x1e   :  { %559 = vmatpush1.bf16.msra.mxu1 %v558_v23  ;;  %497 = vmatprep.subr.bf16.mxu0 %v496_v24  ;;  %v572_v0 = vpack.c.bf16 %v202_v57, %v200_v56  ;;  %v201_v1 = vld [vmem:[%s1160_s2 + $0x150] sm:$0xff]  ;;  %v63_v2 = vld [vmem:[%s1159_s1 + $0x168] sm:$0xff]  ;;  %v65_v3 = vld [vmem:[%s1159_s1 + $0x178] sm:$0xff]  ;;  %v510_v6 = vpack.c.bf16 %v60_v62, %v58_v61 }
  0x1f   :  { %561 = vmatprep.subr.bf16.mxu1 %v560_v28  ;;  %v204_v4 = vld [vmem:[%s1160_s2 + $0x168] sm:$0xff]  ;;  %v206_v5 = vld [vmem:[%s1160_s2 + $0x178] sm:$0xff]  ;;  %v62_v7 = vld [vmem:[%s1159_s1 + $0x160] sm:$0xff]  ;;  %v574_v8 = vpack.c.bf16 %v201_v1, %v199_v63  ;;  %v512_v9 = vpack.c.bf16 %v65_v3, %v63_v2 }
  0x20   :  { %v64_v10 = vld [vmem:[%s1159_s1 + $0x170] sm:$0xff]  ;;  %v203_v11 = vld [vmem:[%s1160_s2 + $0x160] sm:$0xff]  ;;  %v576_v13 = vpack.c.bf16 %v206_v5, %v204_v4  ;;  %v67_v14 = vld [vmem:[%s1159_s1 + $0x188] sm:$0xff] }
  0x21   :  { %499 = vmatpush1.bf16.msra.mxu0 %v498_v34  ;;  %v205_v12 = vld [vmem:[%s1160_s2 + $0x170] sm:$0xff]  ;;  %v69_v15 = vld [vmem:[%s1159_s1 + $0x198] sm:$0xff]  ;;  %v15_v16 = vld [vmem:[%s1161_s0 + $0x8] sm:$0xff]  ;;  %v514_v19 = vpack.c.bf16 %v64_v10, %v62_v7 }
  0x22   :  { %563 = vmatpush1.bf16.msra.mxu1 %v562_v35  ;;  %501 = vmatprep.subr.bf16.mxu0 %v500_v36  ;;  %v208_v17 = vld [vmem:[%s1160_s2 + $0x188] sm:$0xff]  ;;  %v210_v18 = vld [vmem:[%s1160_s2 + $0x198] sm:$0xff]  ;;  %v578_v20 = vpack.c.bf16 %v205_v12, %v203_v11  ;;  %v516_v21 = vpack.c.bf16 %v69_v15, %v67_v14  ;;  %v66_v22 = vld [vmem:[%s1159_s1 + $0x180] sm:$0xff] }
  0x23   :  { %565 = vmatprep.subr.bf16.mxu1 %v564_v40  ;;  %146 = vmatprep.mubr.f32.mxu0 %v15_v16  ;;  %v68_v23 = vld [vmem:[%s1159_s1 + $0x190] sm:$0xff]  ;;  %v207_v24 = vld [vmem:[%s1160_s2 + $0x180] sm:$0xff]  ;;  %v580_v25 = vpack.c.bf16 %v210_v18, %v208_v17  ;;  %v71_v27 = vld [vmem:[%s1159_s1 + $0x1a8] sm:$0xff] }
  0x24   :  { %287 = vmatprep.mubr.f32.mxu1 %v15_v16  ;;  %v209_v26 = vld [vmem:[%s1160_s2 + $0x190] sm:$0xff]  ;;  %v73_v28 = vld [vmem:[%s1159_s1 + $0x1b8] sm:$0xff]  ;;  %v212_v29 = vld [vmem:[%s1160_s2 + $0x1a8] sm:$0xff]  ;;  %v518_v31 = vpack.c.bf16 %v68_v23, %v66_v22 }
  0x25   :  { %503 = vmatpush1.bf16.msra.mxu0 %v502_v46  ;;  %v214_v30 = vld [vmem:[%s1160_s2 + $0x1b8] sm:$0xff]  ;;  %v582_v32 = vpack.c.bf16 %v209_v26, %v207_v24  ;;  %v520_v33 = vpack.c.bf16 %v73_v28, %v71_v27  ;;  %v70_v34 = vld [vmem:[%s1159_s1 + $0x1a0] sm:$0xff]  ;;  %v72_v35 = vld [vmem:[%s1159_s1 + $0x1b0] sm:$0xff] }
  0x26   :  { %567 = vmatpush1.bf16.msra.mxu1 %v566_v47  ;;  %505 = vmatprep.subr.bf16.mxu0 %v504_v48  ;;  %v211_v36 = vld [vmem:[%s1160_s2 + $0x1a0] sm:$0xff]  ;;  %v584_v37 = vpack.c.bf16 %v214_v30, %v212_v29  ;;  %v213_v38 = vld [vmem:[%s1160_s2 + $0x1b0] sm:$0xff]  ;;  %v75_v39 = vld [vmem:[%s1159_s1 + $0x1c8] sm:$0xff]  ;;  %v522_v43 = vpack.c.bf16 %v72_v35, %v70_v34 }
  0x27   :  { %569 = vmatprep.subr.bf16.mxu1 %v568_v52  ;;  %v77_v40 = vld [vmem:[%s1159_s1 + $0x1d8] sm:$0xff]  ;;  %v216_v41 = vld [vmem:[%s1160_s2 + $0x1c8] sm:$0xff]  ;;  %v586_v44 = vpack.c.bf16 %v213_v38, %v211_v36  ;;  %v74_v46 = vld [vmem:[%s1159_s1 + $0x1c0] sm:$0xff] }
  0x28   :  { %v218_v42 = vld [vmem:[%s1160_s2 + $0x1d8] sm:$0xff]  ;;  %v524_v45 = vpack.c.bf16 %v77_v40, %v75_v39  ;;  %v76_v47 = vld [vmem:[%s1159_s1 + $0x1d0] sm:$0xff]  ;;  %v215_v48 = vld [vmem:[%s1160_s2 + $0x1c0] sm:$0xff] }
  0x29   :  { %507 = vmatpush1.bf16.msra.mxu0 %v506_v58  ;;  %v588_v49 = vpack.c.bf16 %v218_v42, %v216_v41  ;;  %v217_v50 = vld [vmem:[%s1160_s2 + $0x1d0] sm:$0xff]  ;;  %v79_v51 = vld [vmem:[%s1159_s1 + $0x1e8] sm:$0xff]  ;;  %v81_v52 = vld [vmem:[%s1159_s1 + $0x1f8] sm:$0xff]  ;;  %v526_v55 = vpack.c.bf16 %v76_v47, %v74_v46 }
  0x2a   :  { %571 = vmatpush1.bf16.msra.mxu1 %v570_v59  ;;  %509 = vmatprep.subr.bf16.mxu0 %v508_v60  ;;  %v220_v53 = vld [vmem:[%s1160_s2 + $0x1e8] sm:$0xff]  ;;  %v222_v54 = vld [vmem:[%s1160_s2 + $0x1f8] sm:$0xff]  ;;  %v590_v56 = vpack.c.bf16 %v217_v50, %v215_v48  ;;  %v528_v57 = vpack.c.bf16 %v81_v52, %v79_v51  ;;  %v78_v58 = vld [vmem:[%s1159_s1 + $0x1e0] sm:$0xff] }
  0x2b   :  { %573 = vmatprep.subr.bf16.mxu1 %v572_v0  ;;  %v80_v59 = vld [vmem:[%s1159_s1 + $0x1f0] sm:$0xff]  ;;  %v592_v60 = vpack.c.bf16 %v222_v54, %v220_v53  ;;  %v219_v61 = vld [vmem:[%s1160_s2 + $0x1e0] sm:$0xff]  ;;  %v17_v2 = vld [vmem:[%s1161_s0 + $0x18] sm:$0xff] }
  0x2c   :  { %v221_v62 = vld [vmem:[%s1160_s2 + $0x1f0] sm:$0xff]  ;;  %v530_v63 = vpack.c.bf16 %v80_v59, %v78_v58  ;;  %v14_v1 = vld [vmem:[%s1161_s0] sm:$0xff] }
  0x2d   :  { %511 = vmatpush1.bf16.msra.mxu0 %v510_v6  ;;  %v594_v0 = vpack.c.bf16 %v221_v62, %v219_v61  ;;  %v16_v3 = vld [vmem:[%s1161_s0 + $0x10] sm:$0xff] }
  0x2e   :  { %575 = vmatpush1.bf16.msra.mxu1 %v574_v8  ;;  %513 = vmatprep.subr.bf16.mxu0 %v512_v9 }
  0x2f   :  { %577 = vmatprep.subr.bf16.mxu1 %v576_v13 }
  0x31   :  { %515 = vmatpush1.bf16.msra.mxu0 %v514_v19 }
  0x32   :  { %579 = vmatpush1.bf16.msra.mxu1 %v578_v20  ;;  %517 = vmatprep.subr.bf16.mxu0 %v516_v21 }
  0x33   :  { %581 = vmatprep.subr.bf16.mxu1 %v580_v25 }
  0x35   :  { %519 = vmatpush1.bf16.msra.mxu0 %v518_v31 }
  0x36   :  { %583 = vmatpush1.bf16.msra.mxu1 %v582_v32  ;;  %521 = vmatprep.subr.bf16.mxu0 %v520_v33 }
  0x37   :  { %585 = vmatprep.subr.bf16.mxu1 %v584_v37 }
  0x39   :  { %523 = vmatpush1.bf16.msra.mxu0 %v522_v43 }
  0x3a   :  { %587 = vmatpush1.bf16.msra.mxu1 %v586_v44  ;;  %525 = vmatprep.subr.bf16.mxu0 %v524_v45 }
  0x3b   :  { %589 = vmatprep.subr.bf16.mxu1 %v588_v49 }
  0x3d   :  { %527 = vmatpush1.bf16.msra.mxu0 %v526_v55 }
  0x3e   :  { %591 = vmatpush1.bf16.msra.mxu1 %v590_v56  ;;  %529 = vmatprep.subr.bf16.mxu0 %v528_v57 }
  0x3f   :  { %593 = vmatprep.subr.bf16.mxu1 %v592_v60 }
  0x41   :  { %531 = vmatpush1.bf16.msra.mxu0 %v530_v63 }
  0x42   :  { %595 = vmatpush1.bf16.msra.mxu1 %v594_v0 }
  0x44   :  { %147 = vmatmul.mubr.f32.vlgmr.msra.gmra.mrb[0].mxu0 %v14_v1 }
  0x45   :  { %288 = vmatmul.mubr.f32.vlgmr.msra.gmra.mrb[0].mxu1 %v14_v1  ;;  %152 = vmatprep.mubr.f32.mxu0 %v17_v2 }
  0x46   :  { %293 = vmatprep.mubr.f32.mxu1 %v17_v2 }
  0x48   :  { %153 = vmatmul.mubr.f32.gmra.mrb[2].mxu0 %v16_v3 }
  0x49   :  { %294 = vmatmul.mubr.f32.gmra.mrb[2].mxu1 %v16_v3 }
 0x117   :  { %v1032_v4 = vpop.f32.mrb[0].mxu0 }
 0x118   :  { %v1035_v5 = vand.u32 2147483647, %v1032_v4  ;;  %v1037_v6 = vpop.f32.mrb[0].mxu1  ;;  %v1039_v7 = vpop.f32.mrb[1].mxu0  ;;  %vm412_vm8 = vcmp.lt.f32.partialorder %v1032_v4, 0.0 }
 0x119   :  { %v1042_v8 = vand.u32 2147483647, %v1037_v6  ;;  %v1045_v9 = vand.u32 2147483647, %v1039_v7  ;;  %v1047_v10 = vpop.f32.mrb[1].mxu1  ;;  %vm413_vm9 = vcmp.lt.f32.partialorder %v1039_v7, 0.0 }
 0x11a   :  { %v1056_v13 = vand.u32 2147483647, %v1047_v10  ;;  %vm424_vm10 = vcmp.lt.f32.partialorder %v1037_v6, 0.0  ;;  %vm425_vm11 = vcmp.lt.f32.partialorder %v1047_v10, 0.0 }
 0x11b   :  { %v308_v11 = vmax.f32 %v1035_v5, %v1042_v8  ;;  %v312_v12 = vmin.f32 %v1035_v5, %v1042_v8  ;;  %vm400_vm0 = vcmp.gt.f32.partialorder %v1042_v8, %v1035_v5  ;;  %v1058_v14 = vpop.f32.mrb[2].mxu0 }
 0x11c   :  { %v1061_v15 = vand.u32 2147483647, %v1058_v14  ;;  %v1063_v16 = vpop.f32.mrb[2].mxu1  ;;  %v1065_v17 = vpop.f32.mrb[3].mxu0  ;;  %v309_v19 = vmax.f32 %v1045_v9, %v1056_v13  ;;  %v313_v20 = vmin.f32 %v1045_v9, %v1056_v13  ;;  %vm401_vm1 = vcmp.gt.f32.partialorder %v1056_v13, %v1045_v9 }
 0x11d   :  { %v316_v18 = vmax.f32 %v308_v11, 1e-30  ;;  %v1073_v21 = vpop.f32.mrb[3].mxu1  ;;  %v1076_v22 = vand.u32 2147483647, %v1063_v16  ;;  %vm414_vm12 = vcmp.lt.f32.partialorder %v1058_v14, 0.0 }
 0x11e   :  { %v1079_v23 = vand.u32 2147483647, %v1065_v17  ;;  %v317_v24 = vmax.f32 %v309_v19, 1e-30  ;;  %v1082_v25 = vand.u32 2147483647, %v1073_v21 }
 0x11f   :  { %599 = vrcp.f32 %v316_v18  ;;  %v310_v26 = vmax.f32 %v1061_v15, %v1076_v22  ;;  %v314_v27 = vmin.f32 %v1061_v15, %v1076_v22  ;;  %vm402_vm2 = vcmp.gt.f32.partialorder %v1076_v22, %v1061_v15 }
 0x120   :  { %601 = vrcp.f32 %v317_v24  ;;  %v311_v28 = vmax.f32 %v1079_v23, %v1082_v25  ;;  %v315_v29 = vmin.f32 %v1079_v23, %v1082_v25  ;;  %vm403_vm3 = vcmp.gt.f32.partialorder %v1082_v25, %v1079_v23 }
 0x121   :  { %v318_v30 = vmax.f32 %v310_v26, 1e-30  ;;  %vm415_vm13 = vcmp.lt.f32.partialorder %v1065_v17, 0.0  ;;  %vm426_vm14 = vcmp.lt.f32.partialorder %v1063_v16, 0.0  ;;  %vm427_vm15 = vcmp.lt.f32.partialorder %v1073_v21, 0.0 }
 0x122   :  { %v319_v31 = vmax.f32 %v311_v28, 1e-30 }
 0x123   :  { %603 = vrcp.f32 %v318_v30 }
 0x124   :  { %605 = vrcp.f32 %v319_v31 }
 0x129   :  { %v600_v32 = vpop.eup %599 }
 0x12a   :  { %v1096_v33 = vmul.f32 %v600_v32, %v312_v12  ;;  %v602_v34 = vpop.eup %601 }
 0x12b   :  { %v1099_v36 = vmul.f32 %v602_v34, %v313_v20 }
 0x12c   :  { %v336_v35 = vadd.f32 1.0, %v1096_v33  ;;  %v456_v44 = vadd.f32 -1.0, %v1096_v33  ;;  %vm328_vm4 = vcmp.gt.f32.partialorder %v1096_v33, 0.41421357 }
 0x12d   :  { %v604_v37 = vpop.eup %603  ;;  %v337_v38 = vadd.f32 1.0, %v1099_v36  ;;  %v457_v47 = vadd.f32 -1.0, %v1099_v36  ;;  %vm329_vm5 = vcmp.gt.f32.partialorder %v1099_v36, 0.41421357 }
 0x12e   :  { %607 = vrcp.f32 %v336_v35  ;;  %v606_v39 = vpop.eup %605  ;;  %v1102_v40 = vmul.f32 %v604_v37, %v314_v27 }
 0x12f   :  { %609 = vrcp.f32 %v337_v38  ;;  %v1104_v41 = vmul.f32 %v606_v39, %v315_v29 }
 0x130   :  { %v338_v42 = vadd.f32 1.0, %v1102_v40  ;;  %v458_v51 = vadd.f32 -1.0, %v1102_v40  ;;  %vm330_vm6 = vcmp.gt.f32.partialorder %v1102_v40, 0.41421357 }
 0x131   :  { %v339_v43 = vadd.f32 1.0, %v1104_v41  ;;  %v459_v54 = vadd.f32 -1.0, %v1104_v41  ;;  %vm331_vm7 = vcmp.gt.f32.partialorder %v1104_v41, 0.41421357 }
 0x132   :  { %611 = vrcp.f32 %v338_v42 }
 0x133   :  { %613 = vrcp.f32 %v339_v43 }
 0x138   :  { %v608_v45 = vpop.eup %607 }
 0x139   :  { %v341_v46 = vmul.f32 %v608_v45, %v456_v44  ;;  %v610_v48 = vpop.eup %609 }
 0x13a   :  { %v343_v49 = vmul.f32 %v610_v48, %v457_v47 }
 0x13b   :  { %v348_v50 = vsel %vm328_vm4, %v341_v46, %v1096_v33 }
 0x13c   :  { %v356_v52 = vmul.f32 %v348_v50, %v348_v50  ;;  %v612_v53 = vpop.eup %611  ;;  %v349_v55 = vsel %vm329_vm5, %v343_v49, %v1099_v36  ;;  %v615_v49 = vmov 0.0  }
 0x13d   :  { %v614_v56 = vpop.eup %613  ;;  %v345_v57 = vmul.f32 %v612_v53, %v458_v51  ;;  %v357_v58 = vmul.f32 %v349_v55, %v349_v55  ;;  %v352_v51 = vsel %vm328_vm4, 0.7853982, %v615_v49 }
 0x13e   :  { %v360_v59 = vmul.f32 0.080537446, %v356_v52  ;;  %v347_v60 = vmul.f32 %v614_v56, %v459_v54 }
 0x13f   :  { %v350_v61 = vsel %vm330_vm6, %v345_v57, %v1102_v40  ;;  %v361_v62 = vmul.f32 0.080537446, %v357_v58 }
 0x140   :  { %v460_v63 = vadd.f32 -0.13877685, %v360_v59  ;;  %v351_v0 = vsel %vm331_vm7, %v347_v60, %v1104_v41  ;;  %v358_v1 = vmul.f32 %v350_v61, %v350_v61  ;;  %v353_v59 = vsel %vm329_vm5, 0.7853982, %v615_v49 }
 0x141   :  { %v359_v2 = vmul.f32 %v351_v0, %v351_v0  ;;  %v461_v3 = vadd.f32 -0.13877685, %v361_v62 }
 0x142   :  { %v368_v11 = vmul.f32 %v460_v63, %v356_v52  ;;  %v362_v12 = vmul.f32 0.080537446, %v358_v1 }
 0x143   :  { %v363_v18 = vmul.f32 0.080537446, %v359_v2  ;;  %v369_v19 = vmul.f32 %v461_v3, %v357_v58 }
 0x144   :  { %v372_v20 = vadd.f32 0.19977711, %v368_v11  ;;  %v462_v24 = vadd.f32 -0.13877685, %v362_v12 }
 0x145   :  { %v463_v26 = vadd.f32 -0.13877685, %v363_v18  ;;  %v373_v27 = vadd.f32 0.19977711, %v369_v19 }
 0x146   :  { %v376_v28 = vmul.f32 %v372_v20, %v356_v52  ;;  %v370_v29 = vmul.f32 %v462_v24, %v358_v1 }
 0x147   :  { %v371_v30 = vmul.f32 %v463_v26, %v359_v2  ;;  %v377_v31 = vmul.f32 %v373_v27, %v357_v58 }
 0x148   :  { %v464_v32 = vadd.f32 -0.3333295, %v376_v28  ;;  %v374_v34 = vadd.f32 0.19977711, %v370_v29 }
 0x149   :  { %v375_v35 = vadd.f32 0.19977711, %v371_v30  ;;  %v465_v37 = vadd.f32 -0.3333295, %v377_v31 }
 0x14a   :  { %v384_v38 = vmul.f32 %v464_v32, %v356_v52  ;;  %v378_v39 = vmul.f32 %v374_v34, %v358_v1 }
 0x14b   :  { %v379_v42 = vmul.f32 %v375_v35, %v359_v2  ;;  %v385_v43 = vmul.f32 %v465_v37, %v357_v58 }
 0x14c   :  { %v388_v44 = vmul.f32 %v384_v38, %v348_v50  ;;  %v466_v45 = vadd.f32 -0.3333295, %v378_v39 }
 0x14d   :  { %v467_v46 = vadd.f32 -0.3333295, %v379_v42  ;;  %v389_v47 = vmul.f32 %v385_v43, %v349_v55 }
 0x14e   :  { %v392_v48 = vadd.f32 %v388_v44, %v348_v50  ;;  %v386_v53 = vmul.f32 %v466_v45, %v358_v1  ;;  %v354_v50 = vsel %vm330_vm6, 0.7853982, %v615_v49 }
 0x14f   :  { %v387_v54 = vmul.f32 %v467_v46, %v359_v2  ;;  %v393_v56 = vadd.f32 %v389_v47, %v349_v55  ;;  %v355_v55 = vsel %vm331_vm7, 0.7853982, %v615_v49 }
 0x150   :  { %v396_v57 = vadd.f32 %v392_v48, %v352_v51  ;;  %v390_v52 = vmul.f32 %v386_v53, %v350_v61 }
 0x151   :  { %v391_v60 = vmul.f32 %v387_v54, %v351_v0  ;;  %v397_v62 = vadd.f32 %v393_v56, %v353_v59 }
 0x152   :  { %v404_v58 = vsub.f32 1.5707964, %v396_v57  ;;  %v394_v63 = vadd.f32 %v390_v52, %v350_v61 }
 0x153   :  { %v395_v3 = vadd.f32 %v391_v60, %v351_v0  ;;  %v405_v11 = vsub.f32 1.5707964, %v397_v62 }
 0x154   :  { %v408_v33 = vsel %vm400_vm0, %v404_v58, %v396_v57  ;;  %v398_v1 = vadd.f32 %v394_v63, %v354_v50 }
 0x155   :  { %v416_v36 = vsub.f32 3.1415927, %v408_v33  ;;  %v399_v2 = vadd.f32 %v395_v3, %v355_v55  ;;  %v409_v61 = vsel %vm401_vm1, %v405_v11, %v397_v62 }
 0x156   :  { %v406_v0 = vsub.f32 1.5707964, %v398_v1  ;;  %v417_v40 = vsub.f32 3.1415927, %v409_v61 }
 0x157   :  { %v420_v12 = vsel %vm412_vm8, %v416_v36, %v408_v33  ;;  %v407_v18 = vsub.f32 1.5707964, %v399_v2 }
 0x158   :  { %v428_v5 = vsub.f32 0.0, %v420_v12  ;;  %v410_v8 = vsel %vm402_vm2, %v406_v0, %v398_v1  ;;  %v421_v41 = vsel %vm413_vm9, %v417_v40, %v409_v61 }
 0x159   :  { %v411_v4 = vsel %vm403_vm3, %v407_v18, %v399_v2  ;;  %v418_v9 = vsub.f32 3.1415927, %v410_v8  ;;  %v429_v13 = vsub.f32 0.0, %v421_v41 }
 0x15a   :  { %v432_v19 = vsel %vm424_vm10, %v428_v5, %v420_v12  ;;  %v419_v7 = vsub.f32 3.1415927, %v411_v4 }
 0x15b   :  { %v422_v6 = vsel %vm414_vm12, %v418_v9, %v410_v8  ;;  %v433_v20 = vsel %vm425_vm11, %v429_v13, %v421_v41 }
 0x15c   :  { %v423_v24 = vsel %vm415_vm13, %v419_v7, %v411_v4  ;;  %v430_v15 = vsub.f32 0.0, %v422_v6 }
 0x15d   :  { %v431_v22 = vsub.f32 0.0, %v423_v24 }
 0x15e   :  { %v434_v23 = vsel %vm426_vm14, %v430_v15, %v422_v6 }
 0x15f   :  { %v435_v25 = vsel %vm427_vm15, %v431_v22, %v423_v24  ;;  %v436_v26 = vsub.f32 %v432_v19, %v434_v23 }
 0x160   :  { %v437_v27 = vsub.f32 %v433_v20, %v435_v25 }
 0x161   :  { %v438_v28 = vand.u32 2147483647, %v436_v26 }
 0x162   :  { %v439_v10 = vand.u32 2147483647, %v437_v27 }
 0x164   :  { %v440_v29 = vadd.f32 %v439_v10, %v438_v28 }
 0x166   :  { %441 = vadd.xlane.f32.xlu0 %v440_v29 }
 0x1f3   :  { %v442_v14 = vpop.xlane.xlu0 %441 }
 0x1f4   :  { %v443_v30 = vrot.slane %v442_v14, 4 }
 0x1f6   :  { %v444_v17 = vadd.f32 %v443_v30, %v442_v14 }
 0x1f8   :  { %v445_v31 = vrot.slane %v444_v17, 2 }
 0x1fa   :  { %v446_v32 = vadd.f32 %v445_v31, %v444_v17 }
 0x1fc   :  { %v447_v34 = vrot.slane %v446_v32, 1 }
 0x1fe   :  { %v448_v35 = vadd.f32 %v447_v34, %v446_v32 }
 0x200   :  { %596 = vpush %v448_v35 }
 0x231   :  { %s597_s0 = spop %596 }
 0x232   :  { %v450_v16 = vstv %s597_s0 }
 0x233   :  { %451 = vst [vmem:[%s1162_s3] sm:$0xff] %v450_v16 }

</bundles_post_ra>
